<compile_context>
chip_gen: v5e
topology: v5e:2x2
jax: 0.10.0
libtpu: 0.0.40
codegen_flags: <defaults>
</compile_context>

<pallas_src>
import functools

import numpy as np
import jax
import jax.numpy as jnp
from jax import lax
from jax.experimental import pallas as pl
from jax.experimental.pallas import tpu as pltpu

WINDOW_SIZE = 11
SIGMA = 1.5
GAMMA = 0.4
LOSS_WEIGHT = 1.0
C1 = 0.01 ** 2
C2 = 0.03 ** 2
_TINY = 1e-30


def _gaussian_1d(window_size=WINDOW_SIZE, sigma=SIGMA):
    x = np.arange(window_size, dtype=np.float64)
    g = np.exp(-((x - window_size // 2) ** 2) / (2.0 * sigma ** 2))
    return (g / g.sum()).astype(np.float32)


def _band_matrix(n, g):
    """Symmetric banded matrix M with M[i, j] = g[i - j + r] for |i-j| <= r.

    z @ M == zero-padded "same" 1-D correlation along the last axis of z.
    M @ z == the same along the first (row) axis (g is symmetric).
    """
    r = len(g) // 2
    m = np.zeros((n, n), dtype=np.float32)
    for i in range(n):
        for j in range(max(0, i - r), min(n, i + r + 1)):
            m[i, j] = g[i - j + r]
    return m


def _ssim_batch_kernel(imax_ref, refl_ref, org_ref, aw_ref, bh_ref, out_ref,
                       *, c, h, w):
    """One grid step == one batch item.  Emits that item's SSIM-map sum."""
    org = org_ref[0]                        # (C, H, W) f32
    refl = refl_ref[0]                      # (C, H, W) f32

    # ---- illumination: vectorized channel max (pure VPU) -------------------
    illum = jnp.max(org, axis=0)            # (H, W)

    # ---- gamma correction; GLOBAL max hoisted into the wrapper -------------
    # TODO(synk): negative illumination maps to 0 here instead of the NaN
    # torch.pow would produce; inputs are assumed non-negative images.
    i_max = imax_ref[0, 0]
    ratio = illum * (1.0 / i_max)
    pw = jnp.exp(GAMMA * jnp.log(jnp.maximum(ratio, _TINY)))    # EUP exp/log
    new_illum = jnp.where(ratio > 0.0, pw, 0.0) * i_max         # (H, W)

    x2 = (refl * new_illum[None, :, :]).reshape(c * h, w)       # img_pred
    y2 = org.reshape(c * h, w)

    a_w = aw_ref[...]                       # (W, W) banded Gaussian
    b_h = bh_ref[...]                       # (H, H) banded Gaussian

    def sep_conv(z2):
        """Depthwise 11x11 Gaussian 'same' conv of C stacked (H, W) slices."""
        tw = jnp.dot(z2, a_w, preferred_element_type=jnp.float32)    # W-pass
        return [jnp.dot(b_h, tw[ci * h:(ci + 1) * h, :],              # H-pass
                        preferred_element_type=jnp.float32)
                for ci in range(c)]

    mu_x = sep_conv(x2)
    mu_y = sep_conv(y2)
    ex2 = sep_conv(x2 * x2)
    ey2 = sep_conv(y2 * y2)
    exy = sep_conv(x2 * y2)

    acc = None
    for ci in range(c):
        mx, my = mu_x[ci], mu_y[ci]
        mx2, my2, mxy = mx * mx, my * my, mx * my
        sx = ex2[ci] - mx2
        sy = ey2[ci] - my2
        sxy = exy[ci] - mxy
        num = (2.0 * mxy + C1) * (2.0 * sxy + C2)
        den = (mx2 + my2 + C1) * (sx + sy + C2)
        inv = pl.reciprocal(den, approx=True)       # EUP slot
        inv = inv * (2.0 - den * inv)               # Newton step -> ~f32 acc.
        ssim_map = num * inv
        acc = ssim_map if acc is None else acc + ssim_map

    psum = jnp.sum(acc)                             # single cross-lane reduce
    out_ref[...] = jnp.full((1, 1, 128), psum, dtype=jnp.float32)


@jax.jit
def reflectance_ssim_loss(reflectance, org_img):
    n, c, h, w = org_img.shape
    g = _gaussian_1d()
    a_w = jnp.asarray(_band_matrix(w, g))           # conv along W (z @ A)
    b_h = jnp.asarray(_band_matrix(h, g))           # conv along H (B @ z)

    refl = reflectance.astype(jnp.float32)
    org = org_img.astype(jnp.float32)
    i_max = jnp.max(org).reshape(1, 1)              # global max hoisted out

    chw = c * h * w
    flops_per_step = (5 * 2 * c * h * w * w         # W-pass matmuls
                      + 5 * c * 2 * h * h * w       # H-pass matmuls
                      + 60 * chw)                   # elementwise SSIM math
    cost = pl.CostEstimate(
        flops=n * flops_per_step,
        transcendentals=n * (2 * h * w + chw),      # exp+log gamma, recip
        bytes_accessed=4 * (2 * n * chw + w * w + h * h + n * 128 + 1))

    # per-step working set: double-buffered input blocks + band matrices +
    # in-body operand / conv temporaries; cap below v7x's 64 MiB physical.
    vmem_est = 4 * (4 * chw + 2 * (w * w + h * h) + 16 * chw + 2 * 128)
    vmem_limit = int(min(56 * 2 ** 20, max(16 * 2 ** 20, 2 * vmem_est)))

    kernel = functools.partial(_ssim_batch_kernel, c=c, h=h, w=w)
    partials = pl.pallas_call(
        kernel,
        out_shape=jax.ShapeDtypeStruct((n, 1, 128), jnp.float32),
        grid=(n,),
        in_specs=[
            pl.BlockSpec(memory_space=pltpu.MemorySpace.SMEM),       # i_max
            pl.BlockSpec((1, c, h, w), lambda i: (i, 0, 0, 0)),      # refl
            pl.BlockSpec((1, c, h, w), lambda i: (i, 0, 0, 0)),      # org
            pl.BlockSpec((w, w), lambda i: (0, 0)),                  # a_w
            pl.BlockSpec((h, h), lambda i: (0, 0)),                  # b_h
        ],
        out_specs=pl.BlockSpec((1, 1, 128), lambda i: (i, 0, 0)),
        compiler_params=pltpu.CompilerParams(
            dimension_semantics=("parallel",),
            vmem_limit_bytes=vmem_limit),
        cost_estimate=cost,
    )(i_max, refl, org, a_w, b_h)

    mean_ssim = jnp.sum(partials[:, 0, 0]) / jnp.float32(n * chw)
    return jnp.float32(LOSS_WEIGHT) * (jnp.float32(1.0) - mean_ssim)


def reference_loss(reflectance, org_img):
    """Pure-JAX reference (independent conv via lax.conv_general_dilated)."""
    n, c, h, w = org_img.shape
    illum = jnp.max(org_img, axis=1, keepdims=True)
    i_max = jnp.max(illum)
    new_illum = jnp.power(illum / i_max, GAMMA) * i_max
    img_pred = reflectance * new_illum

    g = _gaussian_1d()
    w2d = jnp.asarray(np.outer(g, g).astype(np.float32)).reshape(
        1, 1, WINDOW_SIZE, WINDOW_SIZE)
    pad = WINDOW_SIZE // 2

    def conv(z):
        z = z.reshape(n * c, 1, h, w)
        out = lax.conv_general_dilated(
            z, w2d, window_strides=(1, 1),
            padding=((pad, pad), (pad, pad)),
            dimension_numbers=('NCHW', 'OIHW', 'NCHW'))
        return out.reshape(n, c, h, w)

    mu1, mu2 = conv(img_pred), conv(org_img)
    mu1_sq, mu2_sq, mu12 = mu1 * mu1, mu2 * mu2, mu1 * mu2
    s1 = conv(img_pred * img_pred) - mu1_sq
    s2 = conv(org_img * org_img) - mu2_sq
    s12 = conv(img_pred * org_img) - mu12
    ssim_map = ((2 * mu12 + C1) * (2 * s12 + C2)) / (
        (mu1_sq + mu2_sq + C1) * (s1 + s2 + C2))
    return LOSS_WEIGHT * (1.0 - jnp.mean(ssim_map))


if __name__ == "__main__":
    key = jax.random.PRNGKey(0)
    k1, k2 = jax.random.split(key)
    # reflectance and org_img: NCHW, batch=2, channels=4, spatial=16
    reflectance = jax.random.uniform(k1, (2, 4, 16, 16), dtype=jnp.float32)
    org_img = jax.random.uniform(k2, (2, 4, 16, 16), dtype=jnp.float32,
                                 minval=0.05, maxval=1.0)

    loss = reflectance_ssim_loss(reflectance, org_img)
    jax.block_until_ready(loss)

    ref = reference_loss(reflectance, org_img)
    assert np.allclose(np.asarray(loss), np.asarray(ref),
                       rtol=1e-4, atol=1e-5), (loss, ref)
    print("KERNEL_OK")
</pallas_src>

<mosaic_0001>
module attributes {stable_mosaic.version = 11 : i64} {
  func.func @_ssim_batch_kernel(%arg0: i32, %arg1: memref<1x1xf32, #tpu.memory_space<smem>>, %arg2: memref<1x4x16x16xf32, #tpu.memory_space<vmem>>, %arg3: memref<1x4x16x16xf32, #tpu.memory_space<vmem>>, %arg4: memref<16x16xf32, #tpu.memory_space<vmem>>, %arg5: memref<16x16xf32, #tpu.memory_space<vmem>>, %arg6: memref<1x1x128xf32, #tpu.memory_space<vmem>>) attributes {dimension_semantics = [#tpu.dimension_semantics<parallel>], iteration_bounds = array<i64: 2>, scalar_prefetch = 0 : i64, scratch_operands = 0 : i64, tpu.core_type = #tpu.core_type<tc>, window_params = [{transform_indices = @transform_0, window_bounds = array<i64: 1, 1>}, {transform_indices = @transform_1, window_bounds = array<i64: 1, 4, 16, 16>}, {transform_indices = @transform_2, window_bounds = array<i64: 1, 4, 16, 16>}, {pipeline_mode = #tpu.pipeline_mode<synchronous>, transform_indices = @transform_3, window_bounds = array<i64: 16, 16>}, {pipeline_mode = #tpu.pipeline_mode<synchronous>, transform_indices = @transform_4, window_bounds = array<i64: 16, 16>}, {transform_indices = @transform_5, window_bounds = array<i64: 1, 1, 128>}]} {
    %c0 = arith.constant 0 : index
    %c0_0 = arith.constant 0 : index
    %c0_1 = arith.constant 0 : index
    %c0_2 = arith.constant 0 : index
    %0 = vector.load %arg3[%c0, %c0_0, %c0_1, %c0_2] : memref<1x4x16x16xf32, #tpu.memory_space<vmem>>, vector<1x4x16x16xf32>
    %1 = vector.shape_cast %0 : vector<1x4x16x16xf32> to vector<4x16x16xf32>
    %c0_3 = arith.constant 0 : index
    %c0_4 = arith.constant 0 : index
    %c0_5 = arith.constant 0 : index
    %c0_6 = arith.constant 0 : index
    %2 = vector.load %arg2[%c0_3, %c0_4, %c0_5, %c0_6] : memref<1x4x16x16xf32, #tpu.memory_space<vmem>>, vector<1x4x16x16xf32>
    %3 = vector.shape_cast %2 : vector<1x4x16x16xf32> to vector<4x16x16xf32>
    %cst = arith.constant dense<0xFF800000> : vector<16x16xf32>
    %4 = vector.multi_reduction <maximumf>, %1, %cst [0] : vector<4x16x16xf32> to vector<16x16xf32>
    %c0_7 = arith.constant 0 : index
    %c0_8 = arith.constant 0 : index
    %5 = memref.load %arg1[%c0_7, %c0_8] : memref<1x1xf32, #tpu.memory_space<smem>>
    %cst_9 = arith.constant 1.000000e+00 : f32
    %6 = arith.divf %cst_9, %5 : f32
    %7 = vector.broadcast %6 : f32 to vector<16x16xf32>
    %8 = arith.mulf %4, %7 : vector<16x16xf32>
    %cst_10 = arith.constant 1.000000e-30 : f32
    %9 = vector.broadcast %cst_10 : f32 to vector<16x16xf32>
    %10 = arith.maximumf %8, %9 : vector<16x16xf32>
    %11 = math.log %10 : vector<16x16xf32>
    %cst_11 = arith.constant 4.000000e-01 : f32
    %12 = vector.broadcast %cst_11 : f32 to vector<16x16xf32>
    %13 = arith.mulf %12, %11 : vector<16x16xf32>
    %14 = math.exp %13 : vector<16x16xf32>
    %cst_12 = arith.constant 0.000000e+00 : f32
    %15 = vector.broadcast %cst_12 : f32 to vector<16x16xf32>
    %16 = arith.cmpf ogt, %8, %15 : vector<16x16xf32>
    %cst_13 = arith.constant 0.000000e+00 : f32
    %17 = vector.broadcast %cst_13 : f32 to vector<16x16xf32>
    %18 = arith.select %16, %14, %17 : vector<16x16xi1>, vector<16x16xf32>
    %19 = vector.broadcast %5 : f32 to vector<16x16xf32>
    %20 = arith.mulf %18, %19 : vector<16x16xf32>
    %21 = vector.shape_cast %20 : vector<16x16xf32> to vector<1x16x16xf32>
    %22 = vector.broadcast %21 : vector<1x16x16xf32> to vector<4x16x16xf32>
    %23 = arith.mulf %3, %22 : vector<4x16x16xf32>
    %24 = vector.shape_cast %23 : vector<4x16x16xf32> to vector<64x16xf32>
    %25 = vector.shape_cast %1 : vector<4x16x16xf32> to vector<64x16xf32>
    %c0_14 = arith.constant 0 : index
    %c0_15 = arith.constant 0 : index
    %26 = vector.load %arg4[%c0_14, %c0_15] : memref<16x16xf32, #tpu.memory_space<vmem>>, vector<16x16xf32>
    %c0_16 = arith.constant 0 : index
    %c0_17 = arith.constant 0 : index
    %27 = vector.load %arg5[%c0_16, %c0_17] : memref<16x16xf32, #tpu.memory_space<vmem>>, vector<16x16xf32>
    %cst_18 = arith.constant dense<0.000000e+00> : vector<64x16xf32>
    %28 = tpu.matmul %24, %26, %cst_18 {dimension_numbers = #tpu.dot_dimension_numbers<[1], [0], [0], [1], [0, 0, 1, 1], [], []>} : vector<64x16xf32>, vector<16x16xf32>, vector<64x16xf32> -> vector<64x16xf32>
    %29 = vector.extract_strided_slice %28 {offsets = [0, 0], sizes = [16, 16], strides = [1, 1]} : vector<64x16xf32> to vector<16x16xf32>
    %cst_19 = arith.constant dense<0.000000e+00> : vector<16x16xf32>
    %30 = tpu.matmul %27, %29, %cst_19 {dimension_numbers = #tpu.dot_dimension_numbers<[1], [0], [0], [1], [0, 0, 1, 1], [], []>} : vector<16x16xf32>, vector<16x16xf32>, vector<16x16xf32> -> vector<16x16xf32>
    %31 = vector.extract_strided_slice %28 {offsets = [16, 0], sizes = [16, 16], strides = [1, 1]} : vector<64x16xf32> to vector<16x16xf32>
    %cst_20 = arith.constant dense<0.000000e+00> : vector<16x16xf32>
    %32 = tpu.matmul %27, %31, %cst_20 {dimension_numbers = #tpu.dot_dimension_numbers<[1], [0], [0], [1], [0, 0, 1, 1], [], []>} : vector<16x16xf32>, vector<16x16xf32>, vector<16x16xf32> -> vector<16x16xf32>
    %33 = vector.extract_strided_slice %28 {offsets = [32, 0], sizes = [16, 16], strides = [1, 1]} : vector<64x16xf32> to vector<16x16xf32>
    %cst_21 = arith.constant dense<0.000000e+00> : vector<16x16xf32>
    %34 = tpu.matmul %27, %33, %cst_21 {dimension_numbers = #tpu.dot_dimension_numbers<[1], [0], [0], [1], [0, 0, 1, 1], [], []>} : vector<16x16xf32>, vector<16x16xf32>, vector<16x16xf32> -> vector<16x16xf32>
    %35 = vector.extract_strided_slice %28 {offsets = [48, 0], sizes = [16, 16], strides = [1, 1]} : vector<64x16xf32> to vector<16x16xf32>
    %cst_22 = arith.constant dense<0.000000e+00> : vector<16x16xf32>
    %36 = tpu.matmul %27, %35, %cst_22 {dimension_numbers = #tpu.dot_dimension_numbers<[1], [0], [0], [1], [0, 0, 1, 1], [], []>} : vector<16x16xf32>, vector<16x16xf32>, vector<16x16xf32> -> vector<16x16xf32>
    %cst_23 = arith.constant dense<0.000000e+00> : vector<64x16xf32>
    %37 = tpu.matmul %25, %26, %cst_23 {dimension_numbers = #tpu.dot_dimension_numbers<[1], [0], [0], [1], [0, 0, 1, 1], [], []>} : vector<64x16xf32>, vector<16x16xf32>, vector<64x16xf32> -> vector<64x16xf32>
    %38 = vector.extract_strided_slice %37 {offsets = [0, 0], sizes = [16, 16], strides = [1, 1]} : vector<64x16xf32> to vector<16x16xf32>
    %cst_24 = arith.constant dense<0.000000e+00> : vector<16x16xf32>
    %39 = tpu.matmul %27, %38, %cst_24 {dimension_numbers = #tpu.dot_dimension_numbers<[1], [0], [0], [1], [0, 0, 1, 1], [], []>} : vector<16x16xf32>, vector<16x16xf32>, vector<16x16xf32> -> vector<16x16xf32>
    %40 = vector.extract_strided_slice %37 {offsets = [16, 0], sizes = [16, 16], strides = [1, 1]} : vector<64x16xf32> to vector<16x16xf32>
    %cst_25 = arith.constant dense<0.000000e+00> : vector<16x16xf32>
    %41 = tpu.matmul %27, %40, %cst_25 {dimension_numbers = #tpu.dot_dimension_numbers<[1], [0], [0], [1], [0, 0, 1, 1], [], []>} : vector<16x16xf32>, vector<16x16xf32>, vector<16x16xf32> -> vector<16x16xf32>
    %42 = vector.extract_strided_slice %37 {offsets = [32, 0], sizes = [16, 16], strides = [1, 1]} : vector<64x16xf32> to vector<16x16xf32>
    %cst_26 = arith.constant dense<0.000000e+00> : vector<16x16xf32>
    %43 = tpu.matmul %27, %42, %cst_26 {dimension_numbers = #tpu.dot_dimension_numbers<[1], [0], [0], [1], [0, 0, 1, 1], [], []>} : vector<16x16xf32>, vector<16x16xf32>, vector<16x16xf32> -> vector<16x16xf32>
    %44 = vector.extract_strided_slice %37 {offsets = [48, 0], sizes = [16, 16], strides = [1, 1]} : vector<64x16xf32> to vector<16x16xf32>
    %cst_27 = arith.constant dense<0.000000e+00> : vector<16x16xf32>
    %45 = tpu.matmul %27, %44, %cst_27 {dimension_numbers = #tpu.dot_dimension_numbers<[1], [0], [0], [1], [0, 0, 1, 1], [], []>} : vector<16x16xf32>, vector<16x16xf32>, vector<16x16xf32> -> vector<16x16xf32>
    %46 = arith.mulf %24, %24 : vector<64x16xf32>
    %cst_28 = arith.constant dense<0.000000e+00> : vector<64x16xf32>
    %47 = tpu.matmul %46, %26, %cst_28 {dimension_numbers = #tpu.dot_dimension_numbers<[1], [0], [0], [1], [0, 0, 1, 1], [], []>} : vector<64x16xf32>, vector<16x16xf32>, vector<64x16xf32> -> vector<64x16xf32>
    %48 = vector.extract_strided_slice %47 {offsets = [0, 0], sizes = [16, 16], strides = [1, 1]} : vector<64x16xf32> to vector<16x16xf32>
    %cst_29 = arith.constant dense<0.000000e+00> : vector<16x16xf32>
    %49 = tpu.matmul %27, %48, %cst_29 {dimension_numbers = #tpu.dot_dimension_numbers<[1], [0], [0], [1], [0, 0, 1, 1], [], []>} : vector<16x16xf32>, vector<16x16xf32>, vector<16x16xf32> -> vector<16x16xf32>
    %50 = vector.extract_strided_slice %47 {offsets = [16, 0], sizes = [16, 16], strides = [1, 1]} : vector<64x16xf32> to vector<16x16xf32>
    %cst_30 = arith.constant dense<0.000000e+00> : vector<16x16xf32>
    %51 = tpu.matmul %27, %50, %cst_30 {dimension_numbers = #tpu.dot_dimension_numbers<[1], [0], [0], [1], [0, 0, 1, 1], [], []>} : vector<16x16xf32>, vector<16x16xf32>, vector<16x16xf32> -> vector<16x16xf32>
    %52 = vector.extract_strided_slice %47 {offsets = [32, 0], sizes = [16, 16], strides = [1, 1]} : vector<64x16xf32> to vector<16x16xf32>
    %cst_31 = arith.constant dense<0.000000e+00> : vector<16x16xf32>
    %53 = tpu.matmul %27, %52, %cst_31 {dimension_numbers = #tpu.dot_dimension_numbers<[1], [0], [0], [1], [0, 0, 1, 1], [], []>} : vector<16x16xf32>, vector<16x16xf32>, vector<16x16xf32> -> vector<16x16xf32>
    %54 = vector.extract_strided_slice %47 {offsets = [48, 0], sizes = [16, 16], strides = [1, 1]} : vector<64x16xf32> to vector<16x16xf32>
    %cst_32 = arith.constant dense<0.000000e+00> : vector<16x16xf32>
    %55 = tpu.matmul %27, %54, %cst_32 {dimension_numbers = #tpu.dot_dimension_numbers<[1], [0], [0], [1], [0, 0, 1, 1], [], []>} : vector<16x16xf32>, vector<16x16xf32>, vector<16x16xf32> -> vector<16x16xf32>
    %56 = arith.mulf %25, %25 : vector<64x16xf32>
    %cst_33 = arith.constant dense<0.000000e+00> : vector<64x16xf32>
    %57 = tpu.matmul %56, %26, %cst_33 {dimension_numbers = #tpu.dot_dimension_numbers<[1], [0], [0], [1], [0, 0, 1, 1], [], []>} : vector<64x16xf32>, vector<16x16xf32>, vector<64x16xf32> -> vector<64x16xf32>
    %58 = vector.extract_strided_slice %57 {offsets = [0, 0], sizes = [16, 16], strides = [1, 1]} : vector<64x16xf32> to vector<16x16xf32>
    %cst_34 = arith.constant dense<0.000000e+00> : vector<16x16xf32>
    %59 = tpu.matmul %27, %58, %cst_34 {dimension_numbers = #tpu.dot_dimension_numbers<[1], [0], [0], [1], [0, 0, 1, 1], [], []>} : vector<16x16xf32>, vector<16x16xf32>, vector<16x16xf32> -> vector<16x16xf32>
    %60 = vector.extract_strided_slice %57 {offsets = [16, 0], sizes = [16, 16], strides = [1, 1]} : vector<64x16xf32> to vector<16x16xf32>
    %cst_35 = arith.constant dense<0.000000e+00> : vector<16x16xf32>
    %61 = tpu.matmul %27, %60, %cst_35 {dimension_numbers = #tpu.dot_dimension_numbers<[1], [0], [0], [1], [0, 0, 1, 1], [], []>} : vector<16x16xf32>, vector<16x16xf32>, vector<16x16xf32> -> vector<16x16xf32>
    %62 = vector.extract_strided_slice %57 {offsets = [32, 0], sizes = [16, 16], strides = [1, 1]} : vector<64x16xf32> to vector<16x16xf32>
    %cst_36 = arith.constant dense<0.000000e+00> : vector<16x16xf32>
    %63 = tpu.matmul %27, %62, %cst_36 {dimension_numbers = #tpu.dot_dimension_numbers<[1], [0], [0], [1], [0, 0, 1, 1], [], []>} : vector<16x16xf32>, vector<16x16xf32>, vector<16x16xf32> -> vector<16x16xf32>
    %64 = vector.extract_strided_slice %57 {offsets = [48, 0], sizes = [16, 16], strides = [1, 1]} : vector<64x16xf32> to vector<16x16xf32>
    %cst_37 = arith.constant dense<0.000000e+00> : vector<16x16xf32>
    %65 = tpu.matmul %27, %64, %cst_37 {dimension_numbers = #tpu.dot_dimension_numbers<[1], [0], [0], [1], [0, 0, 1, 1], [], []>} : vector<16x16xf32>, vector<16x16xf32>, vector<16x16xf32> -> vector<16x16xf32>
    %66 = arith.mulf %24, %25 : vector<64x16xf32>
    %cst_38 = arith.constant dense<0.000000e+00> : vector<64x16xf32>
    %67 = tpu.matmul %66, %26, %cst_38 {dimension_numbers = #tpu.dot_dimension_numbers<[1], [0], [0], [1], [0, 0, 1, 1], [], []>} : vector<64x16xf32>, vector<16x16xf32>, vector<64x16xf32> -> vector<64x16xf32>
    %68 = vector.extract_strided_slice %67 {offsets = [0, 0], sizes = [16, 16], strides = [1, 1]} : vector<64x16xf32> to vector<16x16xf32>
    %cst_39 = arith.constant dense<0.000000e+00> : vector<16x16xf32>
    %69 = tpu.matmul %27, %68, %cst_39 {dimension_numbers = #tpu.dot_dimension_numbers<[1], [0], [0], [1], [0, 0, 1, 1], [], []>} : vector<16x16xf32>, vector<16x16xf32>, vector<16x16xf32> -> vector<16x16xf32>
    %70 = vector.extract_strided_slice %67 {offsets = [16, 0], sizes = [16, 16], strides = [1, 1]} : vector<64x16xf32> to vector<16x16xf32>
    %cst_40 = arith.constant dense<0.000000e+00> : vector<16x16xf32>
    %71 = tpu.matmul %27, %70, %cst_40 {dimension_numbers = #tpu.dot_dimension_numbers<[1], [0], [0], [1], [0, 0, 1, 1], [], []>} : vector<16x16xf32>, vector<16x16xf32>, vector<16x16xf32> -> vector<16x16xf32>
    %72 = vector.extract_strided_slice %67 {offsets = [32, 0], sizes = [16, 16], strides = [1, 1]} : vector<64x16xf32> to vector<16x16xf32>
    %cst_41 = arith.constant dense<0.000000e+00> : vector<16x16xf32>
    %73 = tpu.matmul %27, %72, %cst_41 {dimension_numbers = #tpu.dot_dimension_numbers<[1], [0], [0], [1], [0, 0, 1, 1], [], []>} : vector<16x16xf32>, vector<16x16xf32>, vector<16x16xf32> -> vector<16x16xf32>
    %74 = vector.extract_strided_slice %67 {offsets = [48, 0], sizes = [16, 16], strides = [1, 1]} : vector<64x16xf32> to vector<16x16xf32>
    %cst_42 = arith.constant dense<0.000000e+00> : vector<16x16xf32>
    %75 = tpu.matmul %27, %74, %cst_42 {dimension_numbers = #tpu.dot_dimension_numbers<[1], [0], [0], [1], [0, 0, 1, 1], [], []>} : vector<16x16xf32>, vector<16x16xf32>, vector<16x16xf32> -> vector<16x16xf32>
    %76 = arith.mulf %30, %30 : vector<16x16xf32>
    %77 = arith.mulf %39, %39 : vector<16x16xf32>
    %78 = arith.mulf %30, %39 : vector<16x16xf32>
    %79 = arith.subf %49, %76 : vector<16x16xf32>
    %80 = arith.subf %59, %77 : vector<16x16xf32>
    %81 = arith.subf %69, %78 : vector<16x16xf32>
    %cst_43 = arith.constant 2.000000e+00 : f32
    %82 = vector.broadcast %cst_43 : f32 to vector<16x16xf32>
    %83 = arith.mulf %82, %78 : vector<16x16xf32>
    %cst_44 = arith.constant 9.99999974E-5 : f32
    %84 = vector.broadcast %cst_44 : f32 to vector<16x16xf32>
    %85 = arith.addf %83, %84 : vector<16x16xf32>
    %cst_45 = arith.constant 2.000000e+00 : f32
    %86 = vector.broadcast %cst_45 : f32 to vector<16x16xf32>
    %87 = arith.mulf %86, %81 : vector<16x16xf32>
    %cst_46 = arith.constant 8.99999984E-4 : f32
    %88 = vector.broadcast %cst_46 : f32 to vector<16x16xf32>
    %89 = arith.addf %87, %88 : vector<16x16xf32>
    %90 = arith.mulf %85, %89 : vector<16x16xf32>
    %91 = arith.addf %76, %77 : vector<16x16xf32>
    %cst_47 = arith.constant 9.99999974E-5 : f32
    %92 = vector.broadcast %cst_47 : f32 to vector<16x16xf32>
    %93 = arith.addf %91, %92 : vector<16x16xf32>
    %94 = arith.addf %79, %80 : vector<16x16xf32>
    %cst_48 = arith.constant 8.99999984E-4 : f32
    %95 = vector.broadcast %cst_48 : f32 to vector<16x16xf32>
    %96 = arith.addf %94, %95 : vector<16x16xf32>
    %97 = arith.mulf %93, %96 : vector<16x16xf32>
    %98 = tpu.reciprocal %97 {approx = true} : vector<16x16xf32> -> vector<16x16xf32>
    %99 = arith.mulf %97, %98 : vector<16x16xf32>
    %cst_49 = arith.constant 2.000000e+00 : f32
    %100 = vector.broadcast %cst_49 : f32 to vector<16x16xf32>
    %101 = arith.subf %100, %99 : vector<16x16xf32>
    %102 = arith.mulf %98, %101 : vector<16x16xf32>
    %103 = arith.mulf %90, %102 : vector<16x16xf32>
    %104 = arith.mulf %32, %32 : vector<16x16xf32>
    %105 = arith.mulf %41, %41 : vector<16x16xf32>
    %106 = arith.mulf %32, %41 : vector<16x16xf32>
    %107 = arith.subf %51, %104 : vector<16x16xf32>
    %108 = arith.subf %61, %105 : vector<16x16xf32>
    %109 = arith.subf %71, %106 : vector<16x16xf32>
    %cst_50 = arith.constant 2.000000e+00 : f32
    %110 = vector.broadcast %cst_50 : f32 to vector<16x16xf32>
    %111 = arith.mulf %110, %106 : vector<16x16xf32>
    %cst_51 = arith.constant 9.99999974E-5 : f32
    %112 = vector.broadcast %cst_51 : f32 to vector<16x16xf32>
    %113 = arith.addf %111, %112 : vector<16x16xf32>
    %cst_52 = arith.constant 2.000000e+00 : f32
    %114 = vector.broadcast %cst_52 : f32 to vector<16x16xf32>
    %115 = arith.mulf %114, %109 : vector<16x16xf32>
    %cst_53 = arith.constant 8.99999984E-4 : f32
    %116 = vector.broadcast %cst_53 : f32 to vector<16x16xf32>
    %117 = arith.addf %115, %116 : vector<16x16xf32>
    %118 = arith.mulf %113, %117 : vector<16x16xf32>
    %119 = arith.addf %104, %105 : vector<16x16xf32>
    %cst_54 = arith.constant 9.99999974E-5 : f32
    %120 = vector.broadcast %cst_54 : f32 to vector<16x16xf32>
    %121 = arith.addf %119, %120 : vector<16x16xf32>
    %122 = arith.addf %107, %108 : vector<16x16xf32>
    %cst_55 = arith.constant 8.99999984E-4 : f32
    %123 = vector.broadcast %cst_55 : f32 to vector<16x16xf32>
    %124 = arith.addf %122, %123 : vector<16x16xf32>
    %125 = arith.mulf %121, %124 : vector<16x16xf32>
    %126 = tpu.reciprocal %125 {approx = true} : vector<16x16xf32> -> vector<16x16xf32>
    %127 = arith.mulf %125, %126 : vector<16x16xf32>
    %cst_56 = arith.constant 2.000000e+00 : f32
    %128 = vector.broadcast %cst_56 : f32 to vector<16x16xf32>
    %129 = arith.subf %128, %127 : vector<16x16xf32>
    %130 = arith.mulf %126, %129 : vector<16x16xf32>
    %131 = arith.mulf %118, %130 : vector<16x16xf32>
    %132 = arith.addf %103, %131 : vector<16x16xf32>
    %133 = arith.mulf %34, %34 : vector<16x16xf32>
    %134 = arith.mulf %43, %43 : vector<16x16xf32>
    %135 = arith.mulf %34, %43 : vector<16x16xf32>
    %136 = arith.subf %53, %133 : vector<16x16xf32>
    %137 = arith.subf %63, %134 : vector<16x16xf32>
    %138 = arith.subf %73, %135 : vector<16x16xf32>
    %cst_57 = arith.constant 2.000000e+00 : f32
    %139 = vector.broadcast %cst_57 : f32 to vector<16x16xf32>
    %140 = arith.mulf %139, %135 : vector<16x16xf32>
    %cst_58 = arith.constant 9.99999974E-5 : f32
    %141 = vector.broadcast %cst_58 : f32 to vector<16x16xf32>
    %142 = arith.addf %140, %141 : vector<16x16xf32>
    %cst_59 = arith.constant 2.000000e+00 : f32
    %143 = vector.broadcast %cst_59 : f32 to vector<16x16xf32>
    %144 = arith.mulf %143, %138 : vector<16x16xf32>
    %cst_60 = arith.constant 8.99999984E-4 : f32
    %145 = vector.broadcast %cst_60 : f32 to vector<16x16xf32>
    %146 = arith.addf %144, %145 : vector<16x16xf32>
    %147 = arith.mulf %142, %146 : vector<16x16xf32>
    %148 = arith.addf %133, %134 : vector<16x16xf32>
    %cst_61 = arith.constant 9.99999974E-5 : f32
    %149 = vector.broadcast %cst_61 : f32 to vector<16x16xf32>
    %150 = arith.addf %148, %149 : vector<16x16xf32>
    %151 = arith.addf %136, %137 : vector<16x16xf32>
    %cst_62 = arith.constant 8.99999984E-4 : f32
    %152 = vector.broadcast %cst_62 : f32 to vector<16x16xf32>
    %153 = arith.addf %151, %152 : vector<16x16xf32>
    %154 = arith.mulf %150, %153 : vector<16x16xf32>
    %155 = tpu.reciprocal %154 {approx = true} : vector<16x16xf32> -> vector<16x16xf32>
    %156 = arith.mulf %154, %155 : vector<16x16xf32>
    %cst_63 = arith.constant 2.000000e+00 : f32
    %157 = vector.broadcast %cst_63 : f32 to vector<16x16xf32>
    %158 = arith.subf %157, %156 : vector<16x16xf32>
    %159 = arith.mulf %155, %158 : vector<16x16xf32>
    %160 = arith.mulf %147, %159 : vector<16x16xf32>
    %161 = arith.addf %132, %160 : vector<16x16xf32>
    %162 = arith.mulf %36, %36 : vector<16x16xf32>
    %163 = arith.mulf %45, %45 : vector<16x16xf32>
    %164 = arith.mulf %36, %45 : vector<16x16xf32>
    %165 = arith.subf %55, %162 : vector<16x16xf32>
    %166 = arith.subf %65, %163 : vector<16x16xf32>
    %167 = arith.subf %75, %164 : vector<16x16xf32>
    %cst_64 = arith.constant 2.000000e+00 : f32
    %168 = vector.broadcast %cst_64 : f32 to vector<16x16xf32>
    %169 = arith.mulf %168, %164 : vector<16x16xf32>
    %cst_65 = arith.constant 9.99999974E-5 : f32
    %170 = vector.broadcast %cst_65 : f32 to vector<16x16xf32>
    %171 = arith.addf %169, %170 : vector<16x16xf32>
    %cst_66 = arith.constant 2.000000e+00 : f32
    %172 = vector.broadcast %cst_66 : f32 to vector<16x16xf32>
    %173 = arith.mulf %172, %167 : vector<16x16xf32>
    %cst_67 = arith.constant 8.99999984E-4 : f32
    %174 = vector.broadcast %cst_67 : f32 to vector<16x16xf32>
    %175 = arith.addf %173, %174 : vector<16x16xf32>
    %176 = arith.mulf %171, %175 : vector<16x16xf32>
    %177 = arith.addf %162, %163 : vector<16x16xf32>
    %cst_68 = arith.constant 9.99999974E-5 : f32
    %178 = vector.broadcast %cst_68 : f32 to vector<16x16xf32>
    %179 = arith.addf %177, %178 : vector<16x16xf32>
    %180 = arith.addf %165, %166 : vector<16x16xf32>
    %cst_69 = arith.constant 8.99999984E-4 : f32
    %181 = vector.broadcast %cst_69 : f32 to vector<16x16xf32>
    %182 = arith.addf %180, %181 : vector<16x16xf32>
    %183 = arith.mulf %179, %182 : vector<16x16xf32>
    %184 = tpu.reciprocal %183 {approx = true} : vector<16x16xf32> -> vector<16x16xf32>
    %185 = arith.mulf %183, %184 : vector<16x16xf32>
    %cst_70 = arith.constant 2.000000e+00 : f32
    %186 = vector.broadcast %cst_70 : f32 to vector<16x16xf32>
    %187 = arith.subf %186, %185 : vector<16x16xf32>
    %188 = arith.mulf %184, %187 : vector<16x16xf32>
    %189 = arith.mulf %176, %188 : vector<16x16xf32>
    %190 = arith.addf %161, %189 : vector<16x16xf32>
    %191 = vector.shape_cast %190 : vector<16x16xf32> to vector<1x16x16xf32>
    %cst_71 = arith.constant dense<0.000000e+00> : vector<1xf32>
    %192 = vector.multi_reduction <add>, %191, %cst_71 [1, 2] : vector<1x16x16xf32> to vector<1xf32>
    %193 = vector.shape_cast %192 : vector<1xf32> to vector<1x1x1xf32>
    %194 = vector.extract %193[0, 0, 0] : f32 from vector<1x1x1xf32>
    %195 = vector.broadcast %194 : f32 to vector<1x1x128xf32>
    %c0_72 = arith.constant 0 : index
    %c0_73 = arith.constant 0 : index
    %c0_74 = arith.constant 0 : index
    %196 = vector.load %arg6[%c0_72, %c0_73, %c0_74] : memref<1x1x128xf32, #tpu.memory_space<vmem>>, vector<1x1x128xf32>
    tpu.vector_store %arg6[%c0_72, %c0_73, %c0_74], %195 {strides = array<i32>} : memref<1x1x128xf32, #tpu.memory_space<vmem>>, vector<1x1x128xf32>,
    return
  }
  func.func @transform_0(%arg0: i32) -> (i32, i32) {
    %c0_i32 = arith.constant 0 : i32
    %c0_i32_0 = arith.constant 0 : i32
    %c0_i32_1 = arith.constant 0 : i32
    return %c0_i32, %c0_i32_0 : i32, i32
  }
  func.func @transform_1(%arg0: i32) -> (i32, i32, i32, i32) {
    %c0_i32 = arith.constant 0 : i32
    %c0_i32_0 = arith.constant 0 : i32
    %c0_i32_1 = arith.constant 0 : i32
    %c0_i32_2 = arith.constant 0 : i32
    return %arg0, %c0_i32, %c0_i32_0, %c0_i32_1 : i32, i32, i32, i32
  }
  func.func @transform_2(%arg0: i32) -> (i32, i32, i32, i32) {
    %c0_i32 = arith.constant 0 : i32
    %c0_i32_0 = arith.constant 0 : i32
    %c0_i32_1 = arith.constant 0 : i32
    %c0_i32_2 = arith.constant 0 : i32
    return %arg0, %c0_i32, %c0_i32_0, %c0_i32_1 : i32, i32, i32, i32
  }
  func.func @transform_3(%arg0: i32) -> (i32, i32) {
    %c0_i32 = arith.constant 0 : i32
    %c0_i32_0 = arith.constant 0 : i32
    %c0_i32_1 = arith.constant 0 : i32
    return %c0_i32, %c0_i32_0 : i32, i32
  }
  func.func @transform_4(%arg0: i32) -> (i32, i32) {
    %c0_i32 = arith.constant 0 : i32
    %c0_i32_0 = arith.constant 0 : i32
    %c0_i32_1 = arith.constant 0 : i32
    return %c0_i32, %c0_i32_0 : i32, i32
  }
  func.func @transform_5(%arg0: i32) -> (i32, i32, i32) {
    %c0_i32 = arith.constant 0 : i32
    %c0_i32_0 = arith.constant 0 : i32
    %c0_i32_1 = arith.constant 0 : i32
    return %arg0, %c0_i32, %c0_i32_0 : i32, i32, i32
  }
}

</mosaic_0001>

<bundles_post_ra>
// kernel: reflectance_ssim_loss.1
= control target key start
LH: loop header
LB: loop body
LE: loop exit
PB: predicated region body
PF: predicated region fallthrough
CT: control target
= control target key end

     0   :  { %s2325_s0 = inlined_call_operand.<no memory space> [shape: f32[1,1], index: 0, kind: input, shape index: {}]   ;;  %s2326_s1 = inlined_call_operand.hbm [shape: f32[2,4,16,16], index: 1, kind: input, shape index: {}]   ;;  %s2327_s2 = inlined_call_operand.vmem [shape: f32[2,4,16,16], index: 2, kind: input, shape index: {}]   ;;  %s2328_s3 = inlined_call_operand.hbm [shape: f32[16,16], index: 3, kind: input, shape index: {}, may-alias: {3,4}]   ;;  %s2329_s4 = inlined_call_operand.hbm [shape: f32[16,16], index: 4, kind: input, shape index: {}, may-alias: {3,4}]   ;;  %s2330_s5 = inlined_call_operand.vmem [shape: f32[2,1,128], index: 5, kind: output, shape index: {}]  }
   0x1   :  { %10 = sst [smem:[#allocation2]] %s2325_s0 }
   0x2   :  { %11 = vsyncpa [#allocation4], 0 }
   0x3   :  { %13 = vsyncpa [#allocation4 + $0x1], 0 }
   0x4   :  { %14 = vsyncpa [#allocation6], 0  ;;  %s1829_s20 = smov 0   ;;  %s1831_s21 = smov 0  }
   0x5   :  { %s1833_s22 = smov 0   ;;  %s1835_s23 = smov 0  }
   0x6 LB: > { %s1848_s0 = sadd.s32 4294967295, %s1790_s23   ;;  %p61_p0 = scmp.ne.s32.totalorder %s1782_s21, %s1778_s20  ;;  %s1790_s23 = sphi %s1835_s23, %s2337_s23   ;;  %s1786_s22 = sphi %s1833_s22, %s2336_s22   ;;  %s1782_s21 = sphi %s1831_s21, %s2335_s21   ;;  %s1778_s20 = sphi %s1829_s20, %s2334_s20  }
   0x7   : > { %p62_p1 = scmp.eq.s32.totalorder %s1848_s0, 0  ;;  %p1473_p2 = scmp.ge.s32.totalorder %s1790_s23, 1 }
   0x8   : > { %p166_p3 = scmp.lt.s32.totalorder %s1790_s23, 3  ;;  %s180_s27 = sshll.u32 %s2328_s3, 4  ;;  %s181_s27 = int_to_ptr.hbm [resolvable:$true] %s180_s27 }
   0x9   : > { %p1856_p4 = por %p62_p1, %p61_p0  ;;  %s1792_s29 = smov [#allocation5]  }
   0xa   : > { %p1863_p5 = pnand %p1473_p2, %p166_p3  ;;  %s182_s30 = sshll.u32 %s1792_s29, 4  ;;  %s183_s30 = int_to_ptr.vmem [resolvable:$true] %s182_s30 }
   0xb   : > { %s194_s8 = sshll.u32 %s2329_s4, 4  ;;  %s1793_s9 = smov 128   ;;  %s195_s8 = int_to_ptr.hbm [resolvable:$true] %s194_s8 }
   0xc   : > { %p1584_p6 = pneg %p1863_p5  ;;  %s1794_s10 = smov 8  }
   0xd   : > { %s1795_s11 = smov [#allocation7]   ;;  %s1881_s13 = sadd.s32 1, %s1790_s23  }
   0xe   : > { %p1585_p7 = pnand %p1584_p6, %p62_p1  ;;  %s196_s12 = sshll.u32 %s1795_s11, 4  ;;  %s197_s12 = int_to_ptr.vmem [resolvable:$true] %s196_s12 }
   0xf   : > { %s48_s14 = sadd.s32 1, %s1786_s22  ;;  %s45_s15 = ssub.s32 %s1790_s23, %s1881_s13 }
  0x10   : > { %1587 = dma.hbm_to_vmem [thread:$0]  (!%p1585_p7), %s181_s27, 256, %s183_s30, [#allocation6], %s1793_s9, %s1793_s9, %s1794_s10  }
  0x11   : > { %1590 = dma.hbm_to_vmem [thread:$0]  (!%p1585_p7), %s195_s8, 256, %s197_s12, [#allocation6], %s1793_s9, %s1793_s9, %s1794_s10  }
  0x12   : > { %p55_p8 = scmp.ne.s32.totalorder %s1786_s22, %s1782_s21  ;;  %p46_p9 = scmp.eq.s32.totalorder %s45_s15, 0 }
  0x13   : > { %p56_p10 = scmp.eq.s32.totalorder %s1790_s23, 0  ;;  %s210_s16 = sand.u32 1, %s1786_s22  }
  0x14   : > { %s1891_s17 = scalar_select %p46_p9, %s1786_s22, %s48_s14  }
  0x15   : > { %p57_p11 = por %p56_p10, %p55_p8  ;;  %p1597_p12 = scmp.lt.s32.totalorder %s1790_s23, 2 }
  0x16   : > { %s1477_s18 = sshll.u32 %s210_s16, 6  ;;  %s1568_s19 = sshll.u32 %s1790_s23, 6 }
  0x17   : > { %s219_s26 = scalar_lea.hbm %s2326_s1, %s1568_s19  ;;  %s214_s29 = scalar_lea.vmem [#allocation3], %s1477_s18 }
  0x18   : > { %s220_s27 = sshll.u32 %s219_s26, 4  ;;  %s222_s30 = sshll.u32 %s214_s29, 4  ;;  %s221_s27 = int_to_ptr.hbm [resolvable:$true] %s220_s27  ;;  %s223_s30 = int_to_ptr.vmem [resolvable:$true] %s222_s30 }
  0x19   : > { %p1898_p13 = pnand %p1597_p12, %p57_p11  ;;  %s211_s7 = scalar_lea.sflag [#allocation4], %s210_s16 }
  0x1a   : > { %s1722_s8 = sshra.s32 %s221_s27, 4  ;;  %s1729_s14 = scalar_lea.hbm %s2326_s1, 128  ;;  %s1723_s8 = int_to_ptr.hbm [resolvable:$true] %s1722_s8 }
  0x1b   : > { %s1724_s11 = scalar_lea.hbm %s1723_s8, 64  ;;  %p1726_p2 = pneg %p1898_p13 }
  0x1c   : > { %p1725_p0 = scmp.ne.s32.totalorder %s1723_s8, %s1724_s11  ;;  %p1730_p7 = scmp.lt.s32.totalorder %s1723_s8, %s2326_s1 }
  0x1d   : > { %p1731_p8 = scmp.lt.s32.totalorder %s1729_s14, %s1724_s11 }
  0x1e   : > { %p1727_p3 = pnand %p1726_p2, %p1725_p0 }
  0x1f   : > { %p1732_p9 = por %p1731_p8, %p1730_p7 }
  0x20   : > { %p1728_p6 = pneg %p1727_p3 }
  0x22   : > { %p1733_p10 = pnand %p1732_p9, %p1728_p6 }
  0x24   : > { %1736 = shalt.err (!%p1733_p10)
}
  0x25   : > { %1594 = dma.hbm_to_vmem [thread:$0]  (!%p1898_p13), %s221_s27, 1024, %s223_s30, %s211_s7, %s1793_s9, %s1793_s9, %s1794_s10  }
  0x26   : > { %242 = sbr.rel (%p1863_p5) target bundleno = 1110 (0x456), region = 40  ;;  %s244_s16 = sand.u32 (!%p1863_p5), 1, %s1782_s21  }
  0x27   : > { %s1481_s19 = sshll.u32 (!%p1863_p5), %s244_s16, 6  ;;  %s245_s20 = scalar_lea.sflag (!%p1863_p5), [#allocation4], %s244_s16 }
  0x28   : > { %s1918_s25 = scalar_lea.vmem (!%p1863_p5), [#allocation3], %s1481_s19 }
  0x2b   : > { %1769 = dma.done.wait (%p1856_p4), %s245_s20, 1024  }
  0x2c   : > { %1771 = vsyncadd (%p1856_p4), %s245_s20, 4294966272 }
  0x2d   : > { %1773 = dma.done.wait (%p62_p1), [#allocation6], 512  }
  0x2e   : > { %1775 = vsyncadd (%p62_p1), [#allocation6], 4294966784  ;;  %s328_s28 = sld [smem:[#allocation2]]  ;;  %p289_p1 = scmp.lt.s32.totalorder %s1848_s0, 1  ;;  %vm313_vm4 = vcmask 130048   ;;  %v1975_v31 = vld [vmem:[#allocation5 + $0x8] sm:$0xff] }
  0x2f   : > { %v1977_v32 = vld [vmem:[#allocation5] sm:$0xff]  ;;  %417 = vmatpush.msra.mxu0 %v1975_v31  ;;  %v306_v56 = vld [vmem:[%s1918_s25 + $0x8] sm:$0xff]  ;;  %v307_v58 = vld [vmem:[%s1918_s25 + $0x10] sm:$0xff] }
  0x30   : > { %s2339_s0 = smov (!%p289_p1, %s1848_s0), 1  ;;  %v305_v50 = vld [vmem:[%s1918_s25] sm:$0xff]  ;;  %v308_v60 = vld [vmem:[%s1918_s25 + $0x18] sm:$0xff] }
  0x31   : > { %s1569_s24 = sshll.u32 %s2339_s0, 6  ;;  %418 = vmatpush.msra.mxu0 %v1977_v32  ;;  %v309_v62 = vld [vmem:[%s1918_s25 + $0x20] sm:$0xff]  ;;  %s296_s6 = scalar_lea.vmem %s2330_s5, %s2339_s0 }
  0x32   : > { %s293_s26 = scalar_lea.vmem %s2327_s2, %s1569_s24 }
  0x33   : > { %v1943_v11 = vld [vmem:[%s293_s26] sm:$0xff]  ;;  %v1945_v12 = vld [vmem:[%s293_s26 + $0x8] sm:$0xff]  ;;  %v1947_v13 = vld [vmem:[%s293_s26 + $0x10] sm:$0xff] }
  0x34   : > { %v1928_v0 = vstv %s328_s28  ;;  %v1949_v14 = vld [vmem:[%s293_s26 + $0x18] sm:$0xff]  ;;  %v1951_v15 = vld [vmem:[%s293_s26 + $0x20] sm:$0xff]  ;;  %v1953_v16 = vld [vmem:[%s293_s26 + $0x28] sm:$0xff]  ;;  %v314_v19 = vsel %vm313_vm4, %v1943_v11, -inf  ;;  %v315_v20 = vsel %vm313_vm4, %v1947_v13, -inf  ;;  %v321_v22 = vsel %vm313_vm4, %v1945_v12, -inf }
  0x35   : > { %1636 = vrcp.f32 %v1928_v0  ;;  %v341_v3 = vand.u32 2147483648, %v1928_v0  ;;  %vm335_vm0 = vweird.f32 %v1928_v0  ;;  %v339_v5 = vand.u32 2147483647, %v1928_v0  ;;  %v1955_v17 = vld [vmem:[%s293_s26 + $0x30] sm:$0xff]  ;;  %v1957_v18 = vld [vmem:[%s293_s26 + $0x38] sm:$0xff] }
  0x36   : > { %v316_v21 = vsel %vm313_vm4, %v1951_v15, -inf  ;;  %v318_v23 = vsel %vm313_vm4, %v1955_v17, -inf  ;;  %v322_v24 = vsel %vm313_vm4, %v1949_v14, -inf  ;;  %v323_v25 = vsel %vm313_vm4, %v1953_v16, -inf }
  0x37   : > { %v342_v7 = vor.u32 1.1754944e-38, %v341_v3  ;;  %vm340_vm3 = vcmp.eq.f32.partialorder %v339_v5, 8.507059e+37  ;;  %v325_v26 = vsel %vm313_vm4, %v1957_v18, -inf  ;;  %v317_v27 = vmax.f32 %v314_v19, %v316_v21 }
  0x38   : > { %v319_v28 = vmax.f32 %v315_v20, %v318_v23  ;;  %v324_v29 = vmax.f32 %v321_v22, %v323_v25  ;;  %v326_v30 = vmax.f32 %v322_v24, %v325_v26 }
  0x3a   : > { %v320_v33 = vmax.f32 %v317_v27, %v319_v28  ;;  %v327_v34 = vmax.f32 %v324_v29, %v326_v30 }
  0x3b   : > { %v1637_v1 = vpop.eup %1636 }
  0x3c   : > { %v331_v2 = vmul.f32 %v1637_v1, %v1928_v0  ;;  %vm336_vm1 = vweird.f32 %v1637_v1 }
  0x3d   : > { %vm337_vm2 = vmor %vm335_vm0, %vm336_vm1 }
  0x3e   : > { %v332_v4 = vsub.f32 1.0, %v331_v2  ;;  %v311_v2 = vld [vmem:[%s1918_s25 + $0x30] sm:$0xff] }
  0x40   : > { %v333_v6 = vmul.f32 %v1637_v1, %v332_v4  ;;  %v312_v4 = vld [vmem:[%s1918_s25 + $0x38] sm:$0xff] }
  0x42   : > { %v334_v8 = vadd.f32 %v1637_v1, %v333_v6 }
  0x44   : > { %v338_v9 = vsel %vm337_vm2, %v1637_v1, %v334_v8  ;;  %v2023_v8 = vld [vmem:[#allocation7] sm:$0xff] }
  0x45   : > { %v343_v10 = vsel %vm340_vm3, %v342_v7, %v338_v9 }
  0x46   : > { %1570 = vpush %v343_v10  ;;  %v2027_v10 = vld [vmem:[#allocation7 + $0x8] sm:$0xff] }
  0x77   : > { %s1571_s27 = spop %1570 }
  0x78   : > { %v345_v35 = vstv %s1571_s27 }
  0x79   : > { %v346_v36 = vmul.f32 %v345_v35, %v320_v33  ;;  %v347_v37 = vmul.f32 %v345_v35, %v327_v34 }
  0x7b   : > { %v348_v38 = vmax.f32 %v346_v36, 1e-30  ;;  %v349_v39 = vmax.f32 %v347_v37, 1e-30  ;;  %vm360_vm5 = vcmp.gt.f32.partialorder %v346_v36, 0.0  ;;  %vm361_vm6 = vcmp.gt.f32.partialorder %v347_v37, 0.0 }
  0x7c   : > { %v864_v36 = vmul.f32 %v1943_v11, %v1943_v11  ;;  %v865_v37 = vmul.f32 %v1945_v12, %v1945_v12 }
  0x7d   : > { %1638 = vlog2.f32 %v348_v38 }
  0x7e   : > { %1640 = vlog2.f32 %v349_v39  ;;  %v867_v39 = vmul.f32 %v1949_v14, %v1949_v14 }
  0x83   : > { %v1639_v40 = vpop.eup %1638 }
  0x84   : > { %v1641_v41 = vpop.eup %1640  ;;  %v351_v42 = vmul.f32 0.6931472, %v1639_v40 }
  0x85   : > { %v353_v43 = vmul.f32 0.6931472, %v1641_v41 }
  0x86   : > { %v354_v44 = vmul.f32 0.4, %v351_v42  ;;  %v868_v42 = vmul.f32 %v1951_v15, %v1951_v15 }
  0x87   : > { %v355_v45 = vmul.f32 0.4, %v353_v43 }
  0x88   : > { %v356_v46 = vmul.f32 1.442695, %v354_v44  ;;  %v869_v44 = vmul.f32 %v1953_v16, %v1953_v16 }
  0x89   : > { %v358_v47 = vmul.f32 1.442695, %v355_v45 }
  0x8a   : > { %1642 = vpow2.f32 %v356_v46  ;;  %v870_v46 = vmul.f32 %v1955_v17, %v1955_v17 }
  0x8b   : > { %1644 = vpow2.f32 %v358_v47 }
  0x90   : > { %v1643_v48 = vpop.eup %1642 }
  0x91   : > { %v362_v49 = vsel %vm360_vm5, %v1643_v48, 0.0  ;;  %v1645_v51 = vpop.eup %1644  ;;  %v871_v48 = vmul.f32 %v1957_v18, %v1957_v18 }
  0x92   : > { %v365_v52 = vmul.f32 %v362_v49, %v1928_v0  ;;  %v363_v54 = vsel %vm361_vm6, %v1645_v51, 0.0 }
  0x93   : > { %v366_v55 = vmul.f32 %v363_v54, %v1928_v0  ;;  %v310_v0 = vld [vmem:[%s1918_s25 + $0x28] sm:$0xff] }
  0x94   : > { %v1983_v53 = vmul.f32 %v365_v52, %v305_v50  ;;  %v1994_v59 = vmul.f32 %v365_v52, %v307_v58  ;;  %v2004_v63 = vmul.f32 %v365_v52, %v309_v62  ;;  %v2014_v3 = vmul.f32 %v365_v52, %v311_v2 }
  0x95   : > { %v1989_v57 = vmul.f32 %v366_v55, %v306_v56  ;;  %v1999_v61 = vmul.f32 %v366_v55, %v308_v60  ;;  %v2009_v1 = vmul.f32 %v366_v55, %v310_v0  ;;  %v2019_v5 = vmul.f32 %v366_v55, %v312_v4 }
  0x96   : > { %1486 = vmatmul.msk.f32.vlgmr.msra.gmra.mxu0 %vm313_vm4, %v1983_v53  ;;  %v699_v38 = vmul.f32 %v1983_v53, %v1983_v53  ;;  %v701_v40 = vmul.f32 %v1994_v59, %v1994_v59  ;;  %v703_v43 = vmul.f32 %v2004_v63, %v2004_v63  ;;  %v705_v47 = vmul.f32 %v2014_v3, %v2014_v3 }
  0x97   : > { %v702_v41 = vmul.f32 %v1999_v61, %v1999_v61  ;;  %v704_v45 = vmul.f32 %v2009_v1, %v2009_v1  ;;  %v706_v49 = vmul.f32 %v2019_v5, %v2019_v5  ;;  %v1029_v50 = vmul.f32 %v1983_v53, %v1943_v11 }
  0x98   : > { %v1030_v51 = vmul.f32 %v1989_v57, %v1945_v12  ;;  %v1031_v52 = vmul.f32 %v1994_v59, %v1947_v13  ;;  %v1033_v2 = vmul.f32 %v2004_v63, %v1951_v15  ;;  %v1034_v4 = vmul.f32 %v2009_v1, %v1953_v16 }
  0x9e   : > { %1487 = vmatmul.msk.f32.gmra.mxu0 %vm313_vm4, %v1989_v57 }
  0xa6   : > { %1488 = vmatmul.msk.f32.gmra.mxu0 %vm313_vm4, %v1994_v59 }
  0xae   : > { %1489 = vmatmul.msk.f32.gmra.mxu0 %vm313_vm4, %v1999_v61 }
  0xb6   : > { %1490 = vmatmul.msk.f32.gmra.mxu0 %vm313_vm4, %v2004_v63 }
  0xbe   : > { %1491 = vmatmul.msk.f32.gmra.mxu0 %vm313_vm4, %v2009_v1 }
  0xc6   : > { %1492 = vmatmul.msk.f32.gmra.mxu0 %vm313_vm4, %v2014_v3 }
  0xce   : > { %1493 = vmatmul.msk.f32.gmra.mxu0 %vm313_vm4, %v2019_v5 }
 0x113   : > { %v420_v6 = vpop.f32.mrf.mxu0 }
 0x11b   : > { %v423_v7 = vpop.f32.mrf.mxu0 }
 0x11c   : > { %464 = vmatpush.msra.mxu1 %v423_v7 }
 0x11e   : > { %465 = vmatpush.msra.mxu1 %v420_v6  ;;  %v1036_v6 = vmul.f32 %v2019_v5, %v1957_v18 }
 0x11f   : > { %1494 = vmatmul.msk.f32.vlgmr.msra.gmra.mxu1 %vm313_vm4, %v2023_v8 }
 0x123   : > { %v426_v9 = vpop.f32.mrf.mxu0 }
 0x127   : > { %1495 = vmatmul.msk.f32.gmra.mxu1 %vm313_vm4, %v2027_v10 }
 0x12b   : > { %v429_v19 = vpop.f32.mrf.mxu0 }
 0x12c   : > { %487 = vmatpush.msra.mxu2 %v429_v19 }
 0x12e   : > { %488 = vmatpush.msra.mxu2 %v426_v9 }
 0x12f   : > { %1496 = vmatmul.msk.f32.vlgmr.msra.gmra.mxu2 %vm313_vm4, %v2023_v8 }
 0x133   : > { %v432_v20 = vpop.f32.mrf.mxu0 }
 0x137   : > { %1497 = vmatmul.msk.f32.gmra.mxu2 %vm313_vm4, %v2027_v10 }
 0x13b   : > { %v435_v21 = vpop.f32.mrf.mxu0 }
 0x13c   : > { %510 = vmatpush.msrb.mxu2 %v435_v21 }
 0x13e   : > { %511 = vmatpush.msrb.mxu2 %v432_v20 }
 0x13f   : > { %1498 = vmatmul.msk.f32.vlgmr.msrb.gmra.mxu2 %vm313_vm4, %v2023_v8 }
 0x140   : > { %580 = vmatpush.msra.mxu2 %v1975_v31 }
 0x142   : > { %581 = vmatpush.msra.mxu2 %v1977_v32 }
 0x143   : > { %v438_v22 = vpop.f32.mrf.mxu0 }
 0x144   : > { %910 = vmatpush.msrb.mxu2 %v1975_v31 }
 0x146   : > { %911 = vmatpush.msrb.mxu2 %v1977_v32 }
 0x147   : > { %1499 = vmatmul.msk.f32.gmra.mxu2 %vm313_vm4, %v2027_v10 }
 0x14b   : > { %v441_v23 = vpop.f32.mrf.mxu0 }
 0x14c   : > { %533 = vmatpush.msrb.mxu1 %v441_v23 }
 0x14e   : > { %534 = vmatpush.msrb.mxu1 %v438_v22 }
 0x14f   : > { %1502 = vmatmul.msk.f32.vlgmr.msra.gmra.mxu2 %vm313_vm4, %v1943_v11  ;;  %1500 = vmatmul.msk.f32.vlgmr.msrb.gmra.mxu1 %vm313_vm4, %v2023_v8  ;;  %v1032_v11 = vmul.f32 %v1999_v61, %v1949_v14 }
 0x157   : > { %1503 = vmatmul.msk.f32.gmra.mxu2 %vm313_vm4, %v1945_v12  ;;  %1501 = vmatmul.msk.f32.gmra.mxu1 %vm313_vm4, %v2027_v10 }
 0x15f   : > { %1504 = vmatmul.msk.f32.gmra.mxu2 %vm313_vm4, %v1947_v13 }
 0x167   : > { %1505 = vmatmul.msk.f32.gmra.mxu2 %vm313_vm4, %v1949_v14 }
 0x16f   : > { %1506 = vmatmul.msk.f32.gmra.mxu2 %vm313_vm4, %v1951_v15  ;;  %v1035_v15 = vmul.f32 %v2014_v3, %v1955_v17 }
 0x177   : > { %1507 = vmatmul.msk.f32.gmra.mxu2 %vm313_vm4, %v1953_v16 }
 0x17f   : > { %1508 = vmatmul.msk.f32.gmra.mxu2 %vm313_vm4, %v1955_v17 }
 0x187   : > { %1509 = vmatmul.msk.f32.gmra.mxu2 %vm313_vm4, %v1957_v18 }
 0x18f   : > { %1534 = vmatmul.msk.f32.vlgmr.msrb.gmra.mxu2 %vm313_vm4, %v864_v36 }
 0x197   : > { %1535 = vmatmul.msk.f32.gmra.mxu2 %vm313_vm4, %v865_v37 }
 0x19c   : > { %v467_v54 = vpop.f32.mrf.mxu1 }
 0x19d   : > { %v2144_v55 = vmul.f32 %v467_v54, %v467_v54 }
 0x1b2   : > { %v2063_v24 = vpop.f32.mrf.mxu2 }
 0x1ba   : > { %v2065_v25 = vpop.f32.mrf.mxu2 }
 0x1c2   : > { %v2067_v26 = vpop.f32.mrf.mxu2 }
 0x1ca   : > { %v2069_v27 = vpop.f32.mrf.mxu2 }
 0x1d2   : > { %v583_v28 = vpop.f32.mrf.mxu2 }
 0x1da   : > { %v586_v29 = vpop.f32.mrf.mxu2 }
 0x1db   : > { %621 = vmatpush.msra.mxu3 %v586_v29 }
 0x1dd   : > { %622 = vmatpush.msra.mxu3 %v583_v28 }
 0x1de   : > { %1510 = vmatmul.msk.f32.vlgmr.msra.gmra.mxu3 %vm313_vm4, %v2023_v8 }
 0x1e2   : > { %v589_v30 = vpop.f32.mrf.mxu2 }
 0x1e6   : > { %1511 = vmatmul.msk.f32.gmra.mxu3 %vm313_vm4, %v2027_v10 }
 0x1ea   : > { %v592_v33 = vpop.f32.mrf.mxu2 }
 0x1eb   : > { %644 = vmatpush.msra.mxu1 %v592_v33 }
 0x1ed   : > { %645 = vmatpush.msra.mxu1 %v589_v30 }
 0x1ee   : > { %1512 = vmatmul.msk.f32.vlgmr.msra.gmra.mxu1 %vm313_vm4, %v2023_v8 }
 0x1f2   : > { %v595_v34 = vpop.f32.mrf.mxu2 }
 0x1f6   : > { %1513 = vmatmul.msk.f32.gmra.mxu1 %vm313_vm4, %v2027_v10 }
 0x1fa   : > { %v598_v35 = vpop.f32.mrf.mxu2 }
 0x1fb   : > { %667 = vmatpush.msrb.mxu3 %v598_v35 }
 0x1fd   : > { %668 = vmatpush.msrb.mxu3 %v595_v34 }
 0x1fe   : > { %1514 = vmatmul.msk.f32.vlgmr.msrb.gmra.mxu3 %vm313_vm4, %v2023_v8 }
 0x1ff   : > { %745 = vmatpush.msra.mxu3 %v1975_v31 }
 0x201   : > { %746 = vmatpush.msra.mxu3 %v1977_v32 }
 0x202   : > { %v601_v53 = vpop.f32.mrf.mxu2 }
 0x203   : > { %1075 = vmatpush.msrb.mxu3 %v1975_v31  ;;  %v866_v31 = vmul.f32 %v1947_v13, %v1947_v13  ;;  %v470_v13 = vpop.f32.mrf.mxu1 }
 0x205   : > { %1076 = vmatpush.msrb.mxu3 %v1977_v32  ;;  %v700_v32 = vmul.f32 %v1989_v57, %v1989_v57  ;;  %1536 = vmatmul.msk.f32.gmra.mxu2 %vm313_vm4, %v866_v31  ;;  %v2157_v57 = vmul.f32 %v470_v13, %v470_v13 }
 0x206   : > { %1515 = vmatmul.msk.f32.gmra.mxu3 %vm313_vm4, %v2027_v10 }
 0x20a   : > { %v604_v61 = vpop.f32.mrf.mxu2 }
 0x20b   : > { %690 = vmatpush.msrb.mxu1 %v604_v61 }
 0x20d   : > { %1537 = vmatmul.msk.f32.gmra.mxu2 %vm313_vm4, %v867_v39  ;;  %691 = vmatpush.msrb.mxu1 %v601_v53 }
 0x20e   : > { %1518 = vmatmul.msk.f32.vlgmr.msra.gmra.mxu3 %vm313_vm4, %v699_v38  ;;  %1516 = vmatmul.msk.f32.vlgmr.msrb.gmra.mxu1 %vm313_vm4, %v2023_v8 }
 0x212   : > { %v913_v16 = vpop.f32.mrf.mxu2 }
 0x215   : > { %1538 = vmatmul.msk.f32.gmra.mxu2 %vm313_vm4, %v868_v42 }
 0x216   : > { %1519 = vmatmul.msk.f32.gmra.mxu3 %vm313_vm4, %v700_v32  ;;  %1517 = vmatmul.msk.f32.gmra.mxu1 %vm313_vm4, %v2027_v10  ;;  %v2227_v32 = vpop.f32.mrf.mxu1 }
 0x21a   : > { %v916_v9 = vpop.f32.mrf.mxu2 }
 0x21d   : > { %1539 = vmatmul.msk.f32.gmra.mxu2 %vm313_vm4, %v869_v44 }
 0x21e   : > { %1520 = vmatmul.msk.f32.gmra.mxu3 %vm313_vm4, %v701_v40 }
 0x225   : > { %1540 = vmatmul.msk.f32.gmra.mxu2 %vm313_vm4, %v870_v46 }
 0x226   : > { %1521 = vmatmul.msk.f32.gmra.mxu3 %vm313_vm4, %v702_v41  ;;  %v2233_v41 = vpop.f32.mrf.mxu1 }
 0x22d   : > { %1541 = vmatmul.msk.f32.gmra.mxu2 %vm313_vm4, %v871_v48 }
 0x22e   : > { %1522 = vmatmul.msk.f32.gmra.mxu3 %vm313_vm4, %v703_v43 }
 0x236   : > { %1523 = vmatmul.msk.f32.gmra.mxu3 %vm313_vm4, %v704_v45 }
 0x23e   : > { %1524 = vmatmul.msk.f32.gmra.mxu3 %vm313_vm4, %v705_v47 }
 0x246   : > { %1525 = vmatmul.msk.f32.gmra.mxu3 %vm313_vm4, %v706_v49 }
 0x24e   : > { %1550 = vmatmul.msk.f32.vlgmr.msrb.gmra.mxu3 %vm313_vm4, %v1029_v50 }
 0x256   : > { %1551 = vmatmul.msk.f32.gmra.mxu3 %vm313_vm4, %v1030_v51 }
 0x25e   : > { %1552 = vmatmul.msk.f32.gmra.mxu3 %vm313_vm4, %v1031_v52 }
 0x261   : > { %v624_v56 = vpop.f32.mrf.mxu3 }
 0x262   : > { %v2146_v58 = vmul.f32 %v624_v56, %v624_v56  ;;  %v2148_v60 = vmul.f32 %v624_v56, %v467_v54 }
 0x264   : > { %v2154_v12 = vadd.f32 %v2146_v58, %v2144_v55 }
 0x266   : > { %1553 = vmatmul.msk.f32.gmra.mxu3 %vm313_vm4, %v1032_v11 }
 0x269   : > { %v627_v59 = vpop.f32.mrf.mxu3 }
 0x26a   : > { %v2159_v62 = vmul.f32 %v627_v59, %v627_v59  ;;  %v2161_v0 = vmul.f32 %v627_v59, %v470_v13 }
 0x26b   : > { %v2237_v42 = vpop.f32.mrf.mxu1 }
 0x26c   : > { %v2167_v14 = vadd.f32 %v2159_v62, %v2157_v57 }
 0x26e   : > { %1554 = vmatmul.msk.f32.gmra.mxu3 %vm313_vm4, %v1033_v2 }
 0x273   : > { %v2242_v45 = vpop.f32.mrf.mxu1 }
 0x276   : > { %1555 = vmatmul.msk.f32.gmra.mxu3 %vm313_vm4, %v1034_v4  ;;  %v1238_v4 = vmul.f32 %v2237_v42, %v2237_v42 }
 0x27e   : > { %1556 = vmatmul.msk.f32.gmra.mxu3 %vm313_vm4, %v1035_v15  ;;  %v1219_v15 = vadd.f32 0.0001, %v2167_v14  ;;  %v1280_v14 = vmul.f32 %v2067_v26, %v2067_v26 }
 0x281   : > { %v2180_v63 = vpop.f32.mrf.mxu3 }
 0x286   : > { %1557 = vmatmul.msk.f32.gmra.mxu3 %vm313_vm4, %v1036_v6 }
 0x288   : > { %v919_v20 = vpop.f32.mrf.mxu2 }
 0x289   : > { %v2185_v7 = vpop.f32.mrf.mxu3 }
 0x28b   : > { %v2245_v48 = vpop.f32.mrf.mxu1 }
 0x290   : > { %v922_v3 = vpop.f32.mrf.mxu2 }
 0x291   : > { %v748_v1 = vpop.f32.mrf.mxu3 }
 0x293   : > { %v2247_v49 = vpop.f32.mrf.mxu1 }
 0x298   : > { %v925_v5 = vpop.f32.mrf.mxu2 }
 0x299   : > { %v751_v19 = vpop.f32.mrf.mxu3 }
 0x29a   : > { %786 = vmatpush.msrb.mxu0 %v751_v19 }
 0x29c   : > { %787 = vmatpush.msrb.mxu0 %v748_v1 }
 0x29d   : > { %1526 = vmatmul.msk.f32.vlgmr.msrb.gmra.mxu0 %vm313_vm4, %v2023_v8 }
 0x2a0   : > { %v928_v23 = vpop.f32.mrf.mxu2 }
 0x2a1   : > { %v754_v17 = vpop.f32.mrf.mxu3 }
 0x2a5   : > { %1527 = vmatmul.msk.f32.gmra.mxu0 %vm313_vm4, %v2027_v10 }
 0x2a8   : > { %v931_v29 = vpop.f32.mrf.mxu2 }
 0x2a9   : > { %v757_v18 = vpop.f32.mrf.mxu3 }
 0x2aa   : > { %809 = vmatpush.msra.mxu1 %v757_v18 }
 0x2ac   : > { %810 = vmatpush.msra.mxu1 %v754_v17 }
 0x2ad   : > { %1528 = vmatmul.msk.f32.vlgmr.msra.gmra.mxu1 %vm313_vm4, %v2023_v8 }
 0x2b0   : > { %v934_v33 = vpop.f32.mrf.mxu2 }
 0x2b1   : > { %v760_v21 = vpop.f32.mrf.mxu3 }
 0x2b5   : > { %1529 = vmatmul.msk.f32.gmra.mxu1 %vm313_vm4, %v2027_v10 }
 0x2b9   : > { %v763_v22 = vpop.f32.mrf.mxu3 }
 0x2ba   : > { %832 = vmatpush.msra.mxu0 %v763_v22 }
 0x2bc   : > { %833 = vmatpush.msra.mxu0 %v760_v21 }
 0x2bd   : > { %1530 = vmatmul.msk.f32.vlgmr.msra.gmra.mxu0 %vm313_vm4, %v2023_v8 }
 0x2be   : > { %951 = vmatpush.msrb.mxu0 %v916_v9 }
 0x2c0   : > { %952 = vmatpush.msrb.mxu0 %v913_v16 }
 0x2c1   : > { %v766_v28 = vpop.f32.mrf.mxu3 }
 0x2c2   : > { %997 = vmatpush.msra.mxu0 %v928_v23 }
 0x2c4   : > { %998 = vmatpush.msra.mxu0 %v925_v5 }
 0x2c5   : > { %1531 = vmatmul.msk.f32.gmra.mxu0 %vm313_vm4, %v2027_v10 }
 0x2c9   : > { %v769_v30 = vpop.f32.mrf.mxu3 }
 0x2ca   : > { %855 = vmatpush.msrb.mxu1 %v769_v30 }
 0x2cc   : > { %856 = vmatpush.msrb.mxu1 %v766_v28 }
 0x2cd   : > { %1532 = vmatmul.msk.f32.vlgmr.msrb.gmra.mxu1 %vm313_vm4, %v2023_v8  ;;  %1542 = vmatmul.msk.f32.vlgmr.msrb.gmra.mxu0 %vm313_vm4, %v2023_v8 }
 0x2ce   : > { %974 = vmatpush.msra.mxu1 %v922_v3 }
 0x2d0   : > { %975 = vmatpush.msra.mxu1 %v919_v20 }
 0x2d1   : > { %v1078_v34 = vpop.f32.mrf.mxu3 }
 0x2d2   : > { %1020 = vmatpush.msrb.mxu1 %v934_v33 }
 0x2d4   : > { %1021 = vmatpush.msrb.mxu1 %v931_v29  ;;  %v1239_v29 = vmul.f32 %v2242_v45, %v2242_v45 }
 0x2d5   : > { %1533 = vmatmul.msk.f32.gmra.mxu1 %vm313_vm4, %v2027_v10  ;;  %1543 = vmatmul.msk.f32.gmra.mxu0 %vm313_vm4, %v2027_v10 }
 0x2d9   : > { %v1081_v35 = vpop.f32.mrf.mxu3 }
 0x2da   : > { %1116 = vmatpush.msrb.mxu0 %v1081_v35 }
 0x2dc   : > { %1117 = vmatpush.msrb.mxu0 %v1078_v34  ;;  %v1237_v34 = vmul.f32 %v2065_v25, %v2065_v25 }
 0x2dd   : > { %1544 = vmatmul.msk.f32.vlgmr.msra.gmra.mxu1 %vm313_vm4, %v2023_v8  ;;  %1546 = vmatmul.msk.f32.vlgmr.msra.gmra.mxu0 %vm313_vm4, %v2023_v8 }
 0x2e1   : > { %v1084_v36 = vpop.f32.mrf.mxu3 }
 0x2e5   : > { %1545 = vmatmul.msk.f32.gmra.mxu1 %vm313_vm4, %v2027_v10  ;;  %1547 = vmatmul.msk.f32.gmra.mxu0 %vm313_vm4, %v2027_v10 }
 0x2e9   : > { %v1087_v37 = vpop.f32.mrf.mxu3 }
 0x2ea   : > { %1139 = vmatpush.msra.mxu1 %v1087_v37  ;;  %v1283_v37 = vmul.f32 %v2185_v7, %v2185_v7 }
 0x2ec   : > { %1140 = vmatpush.msra.mxu1 %v1084_v36 }
 0x2ed   : > { %1548 = vmatmul.msk.f32.vlgmr.msrb.gmra.mxu1 %vm313_vm4, %v2023_v8  ;;  %1558 = vmatmul.msk.f32.vlgmr.msrb.gmra.mxu0 %vm313_vm4, %v2023_v8 }
 0x2f1   : > { %v1090_v38 = vpop.f32.mrf.mxu3 }
 0x2f5   : > { %1549 = vmatmul.msk.f32.gmra.mxu1 %vm313_vm4, %v2027_v10  ;;  %1559 = vmatmul.msk.f32.gmra.mxu0 %vm313_vm4, %v2027_v10 }
 0x2f9   : > { %v1093_v31 = vpop.f32.mrf.mxu3 }
 0x2fa   : > { %1162 = vmatpush.msra.mxu0 %v1093_v31 }
 0x2fc   : > { %1163 = vmatpush.msra.mxu0 %v1090_v38 }
 0x2fd   : > { %1560 = vmatmul.msk.f32.vlgmr.msra.gmra.mxu1 %vm313_vm4, %v2023_v8  ;;  %1562 = vmatmul.msk.f32.vlgmr.msra.gmra.mxu0 %vm313_vm4, %v2023_v8 }
 0x301   : > { %v1096_v39 = vpop.f32.mrf.mxu3 }
 0x305   : > { %1561 = vmatmul.msk.f32.gmra.mxu1 %vm313_vm4, %v2027_v10  ;;  %1563 = vmatmul.msk.f32.gmra.mxu0 %vm313_vm4, %v2027_v10 }
 0x309   : > { %v1099_v40 = vpop.f32.mrf.mxu3 }
 0x30a   : > { %1185 = vmatpush.msrb.mxu1 %v1099_v40  ;;  %v1281_v40 = vmul.f32 %v2069_v27, %v2069_v27 }
 0x30c   : > { %1186 = vmatpush.msrb.mxu1 %v1096_v39 }
 0x30d   : > { %1564 = vmatmul.msk.f32.vlgmr.msrb.gmra.mxu1 %vm313_vm4, %v2023_v8 }
 0x315   : > { %1565 = vmatmul.msk.f32.gmra.mxu1 %vm313_vm4, %v2027_v10 }
 0x31a   : > { %v789_v43 = vpop.f32.mrf.mxu0 }
 0x31b   : > { %v1200_v44 = vsub.f32 %v789_v43, %v2144_v55  ;;  %v1218_v55 = vadd.f32 0.0001, %v2154_v12 }
 0x322   : > { %v792_v46 = vpop.f32.mrf.mxu0 }
 0x323   : > { %v1201_v47 = vsub.f32 %v792_v46, %v2157_v57 }
 0x32a   : > { %v812_v50 = vpop.f32.mrf.mxu1 }
 0x332   : > { %v815_v8 = vpop.f32.mrf.mxu1 }
 0x333   : > { %v1243_v38 = vsub.f32 %v815_v8, %v1237_v34 }
 0x33a   : > { %v835_v51 = vpop.f32.mrf.mxu0 }
 0x33b   : > { %v1286_v28 = vsub.f32 %v835_v51, %v1280_v14 }
 0x342   : > { %v838_v52 = vpop.f32.mrf.mxu0 }
 0x34a   : > { %v2249_v54 = vpop.f32.mrf.mxu1  ;;  %v954_v56 = vpop.f32.mrf.mxu0 }
 0x34b   : > { %v1202_v10 = vsub.f32 %v954_v56, %v2146_v58  ;;  %v1236_v58 = vmul.f32 %v2063_v24, %v2063_v24 }
 0x34d   : > { %v1220_v11 = vadd.f32 %v1202_v10, %v1200_v44  ;;  %v1258_v9 = vadd.f32 %v1238_v4, %v1236_v58  ;;  %v1242_v19 = vsub.f32 %v812_v50, %v1236_v58  ;;  %v1287_v10 = vsub.f32 %v838_v52, %v1281_v40 }
 0x34e   : > { %v1303_v58 = vadd.f32 %v1283_v37, %v1281_v40 }
 0x34f   : > { %v1222_v53 = vadd.f32 0.0009, %v1220_v11  ;;  %v1260_v3 = vadd.f32 0.0001, %v1258_v9  ;;  %v1259_v11 = vadd.f32 %v1239_v29, %v1237_v34 }
 0x351   : > { %v1224_v13 = vmul.f32 %v1222_v53, %v1218_v55  ;;  %v1261_v52 = vadd.f32 0.0001, %v1259_v11 }
 0x352   : > { %v2253_v59 = vpop.f32.mrf.mxu1  ;;  %v957_v57 = vpop.f32.mrf.mxu0 }
 0x353   : > { %v1203_v2 = vsub.f32 %v957_v57, %v2159_v62  ;;  %v1282_v62 = vmul.f32 %v2180_v63, %v2180_v63  ;;  %1646 = vrcp.f32 %v1224_v13 }
 0x355   : > { %v1221_v61 = vadd.f32 %v1203_v2, %v1201_v47  ;;  %v1302_v35 = vadd.f32 %v1282_v62, %v1280_v14  ;;  %v1206_v47 = vmul.f32 2.0, %v2148_v60  ;;  %v1207_v14 = vmul.f32 2.0, %v2161_v0 }
 0x357   : > { %v1223_v6 = vadd.f32 0.0009, %v1221_v61  ;;  %v1304_v50 = vadd.f32 0.0001, %v1302_v35  ;;  %v1208_v61 = vadd.f32 0.0001, %v1206_v47 }
 0x359   : > { %v1225_v16 = vmul.f32 %v1223_v6, %v1219_v15  ;;  %v1647_v33 = vpop.eup %1646  ;;  %v1324_v6 = vmul.f32 %v2227_v32, %v2227_v32 }
 0x35a   : > { %v977_v1 = vpop.f32.mrf.mxu1  ;;  %v1000_v12 = vpop.f32.mrf.mxu0  ;;  %v1228_v31 = vmul.f32 %v1647_v33, %v1224_v13  ;;  %v1326_v13 = vmul.f32 %v2245_v48, %v2245_v48 }
 0x35b   : > { %v1244_v20 = vsub.f32 %v977_v1, %v1238_v4  ;;  %v1288_v21 = vsub.f32 %v1000_v12, %v1282_v62  ;;  %1648 = vrcp.f32 %v1225_v16  ;;  %v1330_v9 = vsub.f32 %v2249_v54, %v1324_v6 }
 0x35c   : > { %v1230_v55 = vsub.f32 2.0, %v1228_v31  ;;  %v1327_v54 = vmul.f32 %v2247_v49, %v2247_v49 }
 0x35d   : > { %v1262_v17 = vadd.f32 %v1244_v20, %v1242_v19  ;;  %v1306_v30 = vadd.f32 %v1288_v21, %v1286_v28  ;;  %v1305_v21 = vadd.f32 0.0001, %v1303_v58  ;;  %v1240_v28 = vmul.f32 %v2237_v42, %v2063_v24 }
 0x35e   : > { %v1232_v12 = vmul.f32 %v1647_v33, %v1230_v55 }
 0x35f   : > { %v1264_v18 = vadd.f32 0.0009, %v1262_v17  ;;  %v1308_v39 = vadd.f32 0.0009, %v1306_v30  ;;  %v1248_v42 = vmul.f32 2.0, %v1240_v28 }
 0x361   : > { %v2265_v5 = vmul.f32 %v1264_v18, %v1260_v3  ;;  %v1310_v53 = vmul.f32 %v1308_v39, %v1304_v50  ;;  %v1649_v2 = vpop.eup %1648 }
 0x362   : > { %v980_v22 = vpop.f32.mrf.mxu1  ;;  %v1003_v23 = vpop.f32.mrf.mxu0  ;;  %v1229_v19 = vmul.f32 %v1649_v2, %v1225_v16 }
 0x363   : > { %v1245_v36 = vsub.f32 %v980_v22, %v1239_v29  ;;  %v1289_v43 = vsub.f32 %v1003_v23, %v1283_v37  ;;  %1650 = vrcp.f32 %v2265_v5  ;;  %v1346_v29 = vadd.f32 %v1326_v13, %v1324_v6 }
 0x364   : > { %1652 = vrcp.f32 %v1310_v53  ;;  %v1231_v16 = vsub.f32 2.0, %v1229_v19  ;;  %v1284_v37 = vmul.f32 %v2180_v63, %v2067_v26 }
 0x365   : > { %v1263_v51 = vadd.f32 %v1245_v36, %v1243_v38  ;;  %v1307_v57 = vadd.f32 %v1289_v43, %v1287_v10  ;;  %v1325_v36 = vmul.f32 %v2233_v41, %v2233_v41  ;;  %v1348_v39 = vadd.f32 0.0001, %v1346_v29 }
 0x366   : > { %v1233_v47 = vmul.f32 %v1649_v2, %v1231_v16 }
 0x367   : > { %v1265_v4 = vadd.f32 0.0009, %v1263_v51  ;;  %v1309_v20 = vadd.f32 0.0009, %v1307_v57  ;;  %v1331_v40 = vsub.f32 %v2253_v59, %v1325_v36  ;;  %v1241_v59 = vmul.f32 %v2242_v45, %v2065_v25 }
 0x369   : > { %v1267_v62 = vmul.f32 %v1265_v4, %v1261_v52  ;;  %v1651_v30 = vpop.eup %1650  ;;  %v1311_v33 = vmul.f32 %v1309_v20, %v1305_v21  ;;  %v1249_v20 = vmul.f32 2.0, %v1241_v59 }
 0x36a   : > { %v1023_v44 = vpop.f32.mrf.mxu1  ;;  %v1119_v46 = vpop.f32.mrf.mxu0  ;;  %v1270_v43 = vmul.f32 %v1651_v30, %v2265_v5  ;;  %v1285_v5 = vmul.f32 %v2185_v7, %v2069_v27 }
 0x36b   : > { %v1204_v56 = vsub.f32 %v1119_v46, %v2148_v60  ;;  %v1332_v60 = vsub.f32 %v1023_v44, %v1326_v13  ;;  %v1653_v35 = vpop.eup %1652  ;;  %1654 = vrcp.f32 %v1267_v62  ;;  %v1250_v13 = vadd.f32 0.0001, %v1248_v42 }
 0x36c   : > { %v1314_v44 = vmul.f32 %v1653_v35, %v1310_v53  ;;  %1656 = vrcp.f32 %v1311_v33  ;;  %v1272_v57 = vsub.f32 2.0, %v1270_v43  ;;  %v1347_v53 = vadd.f32 %v1327_v54, %v1325_v36 }
 0x36d   : > { %v1210_v8 = vmul.f32 2.0, %v1204_v56  ;;  %v1350_v22 = vadd.f32 %v1332_v60, %v1330_v9  ;;  %v1292_v56 = vmul.f32 2.0, %v1284_v37 }
 0x36e   : > { %v1316_v2 = vsub.f32 2.0, %v1314_v44  ;;  %v1274_v9 = vmul.f32 %v1651_v30, %v1272_v57  ;;  %v1251_v30 = vadd.f32 0.0001, %v1249_v20 }
 0x36f   : > { %v1212_v15 = vadd.f32 0.0009, %v1210_v8  ;;  %v1352_v38 = vadd.f32 0.0009, %v1350_v22 }
 0x371   : > { %v1214_v1 = vmul.f32 %v1212_v15, %v1208_v61  ;;  %v1354_v63 = vmul.f32 %v1352_v38, %v1348_v39  ;;  %v1655_v8 = vpop.eup %1654  ;;  %v1294_v15 = vadd.f32 0.0001, %v1292_v56 }
 0x372   : > { %v1026_v17 = vpop.f32.mrf.mxu1  ;;  %v1122_v3 = vpop.f32.mrf.mxu0  ;;  %v1271_v52 = vmul.f32 %v1655_v8, %v1267_v62 }
 0x373   : > { %v2283_v18 = vmul.f32 %v1232_v12, %v1214_v1  ;;  %v1205_v23 = vsub.f32 %v1122_v3, %v2161_v0  ;;  %v1209_v0 = vadd.f32 0.0001, %v1207_v14  ;;  %v1333_v31 = vsub.f32 %v1026_v17, %v1327_v54  ;;  %v1657_v60 = vpop.eup %1656 }
 0x374   : > { %1658 = vrcp.f32 %v1354_v63  ;;  %v1293_v17 = vmul.f32 2.0, %v1285_v5  ;;  %v1349_v3 = vadd.f32 0.0001, %v1347_v53  ;;  %v1318_v14 = vmul.f32 %v1653_v35, %v1316_v2 }
 0x375   : > { %v1211_v34 = vmul.f32 2.0, %v1205_v23  ;;  %v1351_v11 = vadd.f32 %v1333_v31, %v1331_v40  ;;  %v1315_v21 = vmul.f32 %v1657_v60, %v1311_v33  ;;  %v1273_v23 = vsub.f32 2.0, %v1271_v52 }
 0x376   : > { %v1295_v36 = vadd.f32 0.0001, %v1293_v17 }
 0x377   : > { %v1213_v24 = vadd.f32 0.0009, %v1211_v34  ;;  %v1353_v1 = vadd.f32 0.0009, %v1351_v11  ;;  %v1317_v35 = vsub.f32 2.0, %v1315_v21  ;;  %v1275_v42 = vmul.f32 %v1655_v8, %v1273_v23 }
 0x379   : > { %v1215_v46 = vmul.f32 %v1213_v24, %v1209_v0 }
 0x37a   : > { %v1142_v50 = vpop.f32.mrf.mxu1  ;;  %v1165_v51 = vpop.f32.mrf.mxu0 }
 0x37b   : > { %v1246_v10 = vsub.f32 %v1142_v50, %v1240_v28  ;;  %v1290_v26 = vsub.f32 %v1165_v51, %v1284_v37  ;;  %v1235_v55 = vmul.f32 %v1233_v47, %v1215_v46  ;;  %v1355_v28 = vmul.f32 %v1353_v1, %v1349_v3  ;;  %v1659_v34 = vpop.eup %1658 }
 0x37c   : > { %v1328_v37 = vmul.f32 %v2245_v48, %v2227_v32  ;;  %v1358_v31 = vmul.f32 %v1659_v34, %v1354_v63  ;;  %v1319_v46 = vmul.f32 %v1657_v60, %v1317_v35  ;;  %v1329_v48 = vmul.f32 %v2247_v49, %v2233_v41 }
 0x37d   : > { %v1252_v61 = vmul.f32 2.0, %v1246_v10  ;;  %v1296_v4 = vmul.f32 2.0, %v1290_v26  ;;  %1660 = vrcp.f32 %v1355_v28 }
 0x37e   : > { %v1336_v43 = vmul.f32 2.0, %v1328_v37  ;;  %v1360_v47 = vsub.f32 2.0, %v1358_v31 }
 0x37f   : > { %v1254_v6 = vadd.f32 0.0009, %v1252_v61  ;;  %v1298_v58 = vadd.f32 0.0009, %v1296_v4  ;;  %v1337_v61 = vmul.f32 2.0, %v1329_v48 }
 0x380   : > { %v1338_v32 = vadd.f32 0.0001, %v1336_v43  ;;  %v1362_v8 = vmul.f32 %v1659_v34, %v1360_v47 }
 0x381   : > { %v1256_v12 = vmul.f32 %v1254_v6, %v1250_v13  ;;  %v1300_v19 = vmul.f32 %v1298_v58, %v1294_v15  ;;  %v1339_v15 = vadd.f32 0.0001, %v1337_v61 }
 0x382   : > { %v1145_v25 = vpop.f32.mrf.mxu1  ;;  %v1168_v45 = vpop.f32.mrf.mxu0 }
 0x383   : > { %v1276_v27 = vmul.f32 %v1274_v9, %v1256_v12  ;;  %v1247_v7 = vsub.f32 %v1145_v25, %v1241_v59  ;;  %v1291_v22 = vsub.f32 %v1168_v45, %v1285_v5  ;;  %v1320_v29 = vmul.f32 %v1318_v14, %v1300_v19  ;;  %v1661_v10 = vpop.eup %1660 }
 0x384   : > { %v1359_v63 = vmul.f32 %v1661_v10, %v1355_v28 }
 0x385   : > { %v1253_v54 = vmul.f32 2.0, %v1247_v7  ;;  %v1297_v62 = vmul.f32 2.0, %v1291_v22  ;;  %v1278_v16 = vadd.f32 %v1276_v27, %v2283_v18 }
 0x386   : > { %v1361_v5 = vsub.f32 2.0, %v1359_v63 }
 0x387   : > { %v1255_v0 = vadd.f32 0.0009, %v1253_v54  ;;  %v1299_v38 = vadd.f32 0.0009, %v1297_v62  ;;  %v1322_v33 = vadd.f32 %v1320_v29, %v1278_v16 }
 0x388   : > { %v1363_v58 = vmul.f32 %v1661_v10, %v1361_v5 }
 0x389   : > { %v1257_v24 = vmul.f32 %v1255_v0, %v1251_v30  ;;  %v1301_v39 = vmul.f32 %v1299_v38, %v1295_v36 }
 0x38a   : > { %v1188_v40 = vpop.f32.mrf.mxu1 }
 0x38b   : > { %v1277_v44 = vmul.f32 %v1275_v42, %v1257_v24  ;;  %v1334_v18 = vsub.f32 %v1188_v40, %v1328_v37  ;;  %v1321_v50 = vmul.f32 %v1319_v46, %v1301_v39 }
 0x38d   : > { %v1340_v51 = vmul.f32 2.0, %v1334_v18  ;;  %v1279_v56 = vadd.f32 %v1277_v44, %v1235_v55 }
 0x38f   : > { %v1342_v26 = vadd.f32 0.0009, %v1340_v51  ;;  %v1323_v11 = vadd.f32 %v1321_v50, %v1279_v56 }
 0x391   : > { %v1344_v13 = vmul.f32 %v1342_v26, %v1338_v32 }
 0x392   : > { %v1191_v57 = vpop.f32.mrf.mxu1 }
 0x393   : > { %v1335_v4 = vsub.f32 %v1191_v57, %v1329_v48  ;;  %v1364_v59 = vmul.f32 %v1362_v8, %v1344_v13 }
 0x395   : > { %v1341_v53 = vmul.f32 2.0, %v1335_v4  ;;  %v1366_v2 = vadd.f32 %v1364_v59, %v1322_v33 }
 0x397   : > { %v1343_v6 = vadd.f32 0.0009, %v1341_v53  ;;  %v1368_v41 = vsel %vm313_vm4, %v1366_v2, 0.0 }
 0x399   : > { %v1345_v55 = vmul.f32 %v1343_v6, %v1339_v15 }
 0x39b   : > { %v1365_v60 = vmul.f32 %v1363_v58, %v1345_v55 }
 0x39d   : > { %v1367_v52 = vadd.f32 %v1365_v60, %v1323_v11 }
 0x39f   : > { %v1369_v49 = vsel %vm313_vm4, %v1367_v52, 0.0 }
 0x3a0   : > { %v1370_v1 = vadd.f32 %v1369_v49, %v1368_v41 }
 0x3a2   : > { %1371 = vadd.xlane.f32.xlu0 %v1370_v1 }
 0x415   : > { %v1372_v12 = vpop.xlane.xlu0 %1371 }
 0x416   : > { %v1373_v9 = vrot.slane %v1372_v12, 4 }
 0x418   : > { %v1374_v19 = vadd.f32 %v1373_v9, %v1372_v12 }
 0x41a   : > { %v1375_v20 = vrot.slane %v1374_v19, 2 }
 0x41c   : > { %v1376_v17 = vadd.f32 %v1375_v20, %v1374_v19 }
 0x41e   : > { %v1377_v3 = vrot.slane %v1376_v17, 1 }
 0x420   : > { %v1378_v14 = vadd.f32 %v1377_v3, %v1376_v17 }
 0x422   : > { %1572 = vpush %v1378_v14 }
 0x453   : > { %s1573_s7 = spop %1572 }
 0x454   : > { %v1380_v25 = vstv %s1573_s7 }
 0x455   : > { %1381 = vst [vmem:[%s296_s6] sm:$0x1] %v1380_v25 }
 0x456 PF: > { %p17_p4 = scmp.ge.s32.totalorder %s1881_s13, 4   ;;  %s2334_s20 = smov %s1782_s21 }
 0x457   : > { %s2335_s21 = smov %s1786_s22  ;;  %s2336_s22 = smov %s1891_s17 }
 0x458   : > { %s2337_s23 = smov %s1881_s13  ;;  %19 = sbr.rel (!%p17_p4) target bundleno = 6 (0x6), region = 91 }
 0x45d   :  { %1399 = vsyncpa [#allocation4], 1 }
 0x45e   :  { %1401 = vsyncpa [#allocation4 + $0x1], 1 }
 0x45f   :  { %1402 = vsyncpa [#allocation6], 1 }

</bundles_post_ra>
